<compile_context>
chip_gen: v7x
topology: tpu7x:2x2x1
jax: 0.10.0
libtpu: 0.0.40
codegen_flags: <defaults>
</compile_context>

<pallas_src>
import jax
import jax.numpy as jnp
from jax.experimental import pallas as pl
from jax.experimental.pallas import tpu as pltpu


# --------------------------------------------------------------------------- #
# Kernel: the whole forward pass on one batch tile, batch-major.
# --------------------------------------------------------------------------- #
def _action_mode_kernel(
    jp_ref,                      # (TB, 7)   joint_pos
    tg_ref,                      # (TB, 4)   [target_pos | gripper_open]
    w1_ref, b1_ref,              # fc1:                (7, 20), (1, 20)
    w3p_ref,                     # fc3 folded into Wp: (20, 30)
    wtg_ref,                     # Wp rows 10:14:      (4, 30)
    bp_ref,                      # bp + b3 @ Wp_j:     (1, 30)
    wo_ref, bo_ref,              # output layer:       (30, 7), (1, 7)
    out_ref,                     # (TB, 7)
):
    # joint_pos_policy fc1 + relu: (TB,7) @ (7,20) -> (TB,20)
    h = jnp.dot(jp_ref[...], w1_ref[...], preferred_element_type=jnp.float32)
    h = jnp.maximum(h + b1_ref[...], 0.0)

    # pre_pred_layer over concat([fc3(h), target_pos, gripper_open]);
    # fc3 is algebraically folded into w3p / bp on the host.
    pre = (
        jnp.dot(h, w3p_ref[...], preferred_element_type=jnp.float32)
        + jnp.dot(tg_ref[...], wtg_ref[...], preferred_element_type=jnp.float32)
        + bp_ref[...]
    )
    pre = jnp.maximum(pre, 0.0)

    # output_layer: (TB,30) @ (30,7) -> (TB,7), stored batch-major.
    out = jnp.dot(pre, wo_ref[...], preferred_element_type=jnp.float32) + bo_ref[...]
    out_ref[...] = out.astype(out_ref.dtype)


# --------------------------------------------------------------------------- #
# Tiling: few, large, 128-aligned tiles; even step count for v7x megacore.
# --------------------------------------------------------------------------- #
def _round_up(x, m):
    return ((x + m - 1) // m) * m


def _pick_tile(batch, batch_tile):
    if batch <= 256:
        return batch                                   # single full-array block
    if batch <= 2 * batch_tile:
        return _round_up(pl.cdiv(batch, 2), 128)       # exactly 2 steps
    steps = 2 * pl.cdiv(batch, 2 * batch_tile)         # even number of steps
    return _round_up(pl.cdiv(batch, steps), 128)


def _pallas_forward(jp, tg, p, batch_tile):
    batch = jp.shape[0]
    action_dims = p["wo"].shape[1]
    tb = _pick_tile(batch, batch_tile)
    grid = (pl.cdiv(batch, tb),)

    def act_spec(feat):
        return pl.BlockSpec((tb, feat), lambda i: (i, 0))

    def const_spec(shape):
        # Constant block index -> weight stays VMEM-resident across grid steps.
        return pl.BlockSpec(shape, lambda i: (0, 0))

    in_specs = [
        act_spec(jp.shape[1]),
        act_spec(tg.shape[1]),
        const_spec(p["w1"].shape), const_spec(p["b1"].shape),
        const_spec(p["w3p"].shape), const_spec(p["wtg"].shape),
        const_spec(p["bp"].shape),
        const_spec(p["wo"].shape), const_spec(p["bo"].shape),
    ]
    out_spec = pl.BlockSpec((tb, action_dims), lambda i: (i, 0))

    # ~640 B/row covers double-buffered in/out blocks + spilled intermediates;
    # floor of 32 MiB lifts v5e's 16 MiB default, cap stays under v7x physical.
    vmem_limit = int(min(48 * 2**20, max(32 * 2**20, 640 * tb)))

    return pl.pallas_call(
        _action_mode_kernel,
        out_shape=jax.ShapeDtypeStruct((batch, action_dims), jnp.float32),
        grid=grid,
        in_specs=in_specs,
        out_specs=out_spec,
        compiler_params=pltpu.CompilerParams(
            dimension_semantics=("parallel",),   # shard batch tiles over TCs (v7x)
            vmem_limit_bytes=vmem_limit,
        ),
    )(jp, tg, p["w1"], p["b1"], p["w3p"], p["wtg"], p["bp"], p["wo"], p["bo"])


# --------------------------------------------------------------------------- #
# Host-side (hoisted) parameter folding + per-call forward.
# --------------------------------------------------------------------------- #
def prepare_params(params):
    """Fold fc3 into the pre_pred layer; slice the merged [target|gripper] weight.
    Call ONCE per parameter set (hoisted out of the per-call path)."""
    wp = params["wp"]                                   # (14, 30)
    wp_j = wp[:10]
    return {
        "w1": params["w1"], "b1": params["b1"],
        "w3p": params["w3"] @ wp_j,                     # (20, 30) fc3 folded in
        "wtg": wp[10:14],                               # (4, 30)  [target|gripper]
        "bp": params["bp"] + params["b3"] @ wp_j,       # (1, 30)  fused bias
        "wo": params["wo"], "bo": params["bo"],
    }


def _fused_jax_forward(jp, tg, p):
    h = jax.nn.relu(jp @ p["w1"] + p["b1"])
    pre = jax.nn.relu(h @ p["w3p"] + tg @ p["wtg"] + p["bp"])
    return pre @ p["wo"] + p["bo"]


def action_mode_estimator(joint_pos, target_pos, gripper_open, prepared_params,
                          *, batch_tile=8192, min_pallas_batch=1024):
    """Forward pass; batch-major I/O exactly like the PyTorch module:
    (B,7), (B,3), (B,1) -> (B,7)."""
    # TODO(synk): if the caller can supply [target_pos|gripper_open] pre-stacked,
    # this small concatenate (one extra ~16 B/row XLA pass) also disappears.
    tg = jnp.concatenate([target_pos, gripper_open], axis=1)        # (B, 4)
    batch = joint_pos.shape[0]
    if batch < min_pallas_batch:
        # Tiny batches: pallas_call dispatch + DMA setup dominates; fused XLA wins.
        return _fused_jax_forward(joint_pos, tg, prepared_params)
    return _pallas_forward(joint_pos, tg, prepared_params, batch_tile)


def make_forward(params, *, batch_tile=8192, min_pallas_batch=1024):
    """One-time parameter folding + a single jitted per-call forward."""
    prepared = prepare_params(params)

    def fwd(joint_pos, target_pos, gripper_open):
        return action_mode_estimator(
            joint_pos, target_pos, gripper_open, prepared,
            batch_tile=batch_tile, min_pallas_batch=min_pallas_batch)

    return jax.jit(fwd)


# --------------------------------------------------------------------------- #
# Synthetic params + pure-JAX reference mirroring the PyTorch forward exactly.
# --------------------------------------------------------------------------- #
def init_params(key,
                action_dims=7,
                hidden_pre_pred_dims=30,
                joint_pos_policy_hidden=20,
                modular_policy_op_dims=10):
    ks = jax.random.split(key, 8)
    f32 = jnp.float32
    input_tensor_dims = modular_policy_op_dims + 3 + 1  # 14
    return {
        "w1": jax.random.normal(ks[0], (7, joint_pos_policy_hidden), f32) * 0.1,
        "b1": jax.random.normal(ks[1], (1, joint_pos_policy_hidden), f32) * 0.1,
        "w3": jax.random.normal(ks[2], (joint_pos_policy_hidden, modular_policy_op_dims), f32) * 0.1,
        "b3": jax.random.normal(ks[3], (1, modular_policy_op_dims), f32) * 0.1,
        "wp": jax.random.normal(ks[4], (input_tensor_dims, hidden_pre_pred_dims), f32) * 0.1,
        "bp": jax.random.normal(ks[5], (1, hidden_pre_pred_dims), f32) * 0.1,
        "wo": jax.random.normal(ks[6], (hidden_pre_pred_dims, action_dims), f32) * 0.1,
        "bo": jax.random.normal(ks[7], (1, action_dims), f32) * 0.1,
    }


def reference_forward(joint_pos, target_pos, gripper_open, params):
    h = jax.nn.relu(joint_pos @ params["w1"] + params["b1"])
    jop = h @ params["w3"] + params["b3"]
    stacked = jnp.concatenate([jop, target_pos, gripper_open], axis=1)
    p = jax.nn.relu(stacked @ params["wp"] + params["bp"])
    return p @ params["wo"] + params["bo"]


def _check(fwd, batch, params, key, label):
    k1, k2, k3 = jax.random.split(key, 3)
    joint_pos = jax.random.normal(k1, (batch, 7), jnp.float32)
    target_pos = jax.random.normal(k2, (batch, 3), jnp.float32)
    gripper_open = (jax.random.uniform(k3, (batch, 1)) > 0.5).astype(jnp.float32)

    out = jax.block_until_ready(fwd(joint_pos, target_pos, gripper_open))
    ref = reference_forward(joint_pos, target_pos, gripper_open, params)
    assert out.shape == (batch, 7), label
    assert jnp.allclose(out, ref, atol=1e-4, rtol=1e-4), f"mismatch: {label}"
    return out


if __name__ == "__main__":
    key = jax.random.PRNGKey(0)
    kp, kd1, kd2, kd3 = jax.random.split(key, 4)
    params = init_params(kp)

    # Small-shape check through the Pallas kernel (single full-array block).
    fwd_forced = make_forward(params, min_pallas_batch=0)
    _check(fwd_forced, 2, params, kd1, "pallas B=2")
    # Ragged multi-tile check: 128-aligned tile, grid=(2,), partial edge block.
    _check(fwd_forced, 300, params, kd2, "pallas B=300")
    # Default config: large batch -> two 2048-row tiles ("parallel" across TCs on v7x).
    fwd = make_forward(params)
    _check(fwd, 4096, params, kd3, "pallas B=4096")

    print("KERNEL_OK")
</pallas_src>

<mosaic_0001>
module attributes {stable_mosaic.version = 11 : i64} {
  func.func @_action_mode_kernel(%arg0: i32, %arg1: memref<2x7xf32, #tpu.memory_space<vmem>>, %arg2: memref<2x4xf32, #tpu.memory_space<vmem>>, %arg3: memref<7x20xf32, #tpu.memory_space<vmem>>, %arg4: memref<1x20xf32, #tpu.memory_space<vmem>>, %arg5: memref<20x30xf32, #tpu.memory_space<vmem>>, %arg6: memref<4x30xf32, #tpu.memory_space<vmem>>, %arg7: memref<1x30xf32, #tpu.memory_space<vmem>>, %arg8: memref<30x7xf32, #tpu.memory_space<vmem>>, %arg9: memref<1x7xf32, #tpu.memory_space<vmem>>, %arg10: memref<2x7xf32, #tpu.memory_space<vmem>>) attributes {dimension_semantics = [#tpu.dimension_semantics<parallel>], iteration_bounds = array<i64: 1>, scalar_prefetch = 0 : i64, scratch_operands = 0 : i64, tpu.core_type = #tpu.core_type<tc>, window_params = [{transform_indices = @transform_0, window_bounds = array<i64: 2, 7>}, {transform_indices = @transform_1, window_bounds = array<i64: 2, 4>}, {pipeline_mode = #tpu.pipeline_mode<synchronous>, transform_indices = @transform_2, window_bounds = array<i64: 7, 20>}, {pipeline_mode = #tpu.pipeline_mode<synchronous>, transform_indices = @transform_3, window_bounds = array<i64: 1, 20>}, {pipeline_mode = #tpu.pipeline_mode<synchronous>, transform_indices = @transform_4, window_bounds = array<i64: 20, 30>}, {pipeline_mode = #tpu.pipeline_mode<synchronous>, transform_indices = @transform_5, window_bounds = array<i64: 4, 30>}, {pipeline_mode = #tpu.pipeline_mode<synchronous>, transform_indices = @transform_6, window_bounds = array<i64: 1, 30>}, {pipeline_mode = #tpu.pipeline_mode<synchronous>, transform_indices = @transform_7, window_bounds = array<i64: 30, 7>}, {pipeline_mode = #tpu.pipeline_mode<synchronous>, transform_indices = @transform_8, window_bounds = array<i64: 1, 7>}, {transform_indices = @transform_9, window_bounds = array<i64: 2, 7>}]} {
    %c0 = arith.constant 0 : index
    %c0_0 = arith.constant 0 : index
    %0 = vector.load %arg1[%c0, %c0_0] : memref<2x7xf32, #tpu.memory_space<vmem>>, vector<2x7xf32>
    %c0_1 = arith.constant 0 : index
    %c0_2 = arith.constant 0 : index
    %1 = vector.load %arg3[%c0_1, %c0_2] : memref<7x20xf32, #tpu.memory_space<vmem>>, vector<7x20xf32>
    %cst = arith.constant dense<0.000000e+00> : vector<2x20xf32>
    %2 = tpu.matmul %0, %1, %cst {dimension_numbers = #tpu.dot_dimension_numbers<[1], [0], [0], [1], [0, 0, 1, 1], [], []>} : vector<2x7xf32>, vector<7x20xf32>, vector<2x20xf32> -> vector<2x20xf32>
    %c0_3 = arith.constant 0 : index
    %c0_4 = arith.constant 0 : index
    %3 = vector.load %arg4[%c0_3, %c0_4] : memref<1x20xf32, #tpu.memory_space<vmem>>, vector<1x20xf32>
    %4 = vector.broadcast %3 : vector<1x20xf32> to vector<2x20xf32>
    %5 = arith.addf %2, %4 : vector<2x20xf32>
    %cst_5 = arith.constant 0.000000e+00 : f32
    %6 = vector.broadcast %cst_5 : f32 to vector<2x20xf32>
    %7 = arith.maximumf %5, %6 : vector<2x20xf32>
    %c0_6 = arith.constant 0 : index
    %c0_7 = arith.constant 0 : index
    %8 = vector.load %arg5[%c0_6, %c0_7] : memref<20x30xf32, #tpu.memory_space<vmem>>, vector<20x30xf32>
    %cst_8 = arith.constant dense<0.000000e+00> : vector<2x30xf32>
    %9 = tpu.matmul %7, %8, %cst_8 {dimension_numbers = #tpu.dot_dimension_numbers<[1], [0], [0], [1], [0, 0, 1, 1], [], []>} : vector<2x20xf32>, vector<20x30xf32>, vector<2x30xf32> -> vector<2x30xf32>
    %c0_9 = arith.constant 0 : index
    %c0_10 = arith.constant 0 : index
    %10 = vector.load %arg2[%c0_9, %c0_10] : memref<2x4xf32, #tpu.memory_space<vmem>>, vector<2x4xf32>
    %c0_11 = arith.constant 0 : index
    %c0_12 = arith.constant 0 : index
    %11 = vector.load %arg6[%c0_11, %c0_12] : memref<4x30xf32, #tpu.memory_space<vmem>>, vector<4x30xf32>
    %cst_13 = arith.constant dense<0.000000e+00> : vector<2x30xf32>
    %12 = tpu.matmul %10, %11, %cst_13 {dimension_numbers = #tpu.dot_dimension_numbers<[1], [0], [0], [1], [0, 0, 1, 1], [], []>} : vector<2x4xf32>, vector<4x30xf32>, vector<2x30xf32> -> vector<2x30xf32>
    %13 = arith.addf %9, %12 : vector<2x30xf32>
    %c0_14 = arith.constant 0 : index
    %c0_15 = arith.constant 0 : index
    %14 = vector.load %arg7[%c0_14, %c0_15] : memref<1x30xf32, #tpu.memory_space<vmem>>, vector<1x30xf32>
    %15 = vector.broadcast %14 : vector<1x30xf32> to vector<2x30xf32>
    %16 = arith.addf %13, %15 : vector<2x30xf32>
    %cst_16 = arith.constant 0.000000e+00 : f32
    %17 = vector.broadcast %cst_16 : f32 to vector<2x30xf32>
    %18 = arith.maximumf %16, %17 : vector<2x30xf32>
    %c0_17 = arith.constant 0 : index
    %c0_18 = arith.constant 0 : index
    %19 = vector.load %arg8[%c0_17, %c0_18] : memref<30x7xf32, #tpu.memory_space<vmem>>, vector<30x7xf32>
    %cst_19 = arith.constant dense<0.000000e+00> : vector<2x7xf32>
    %20 = tpu.matmul %18, %19, %cst_19 {dimension_numbers = #tpu.dot_dimension_numbers<[1], [0], [0], [1], [0, 0, 1, 1], [], []>} : vector<2x30xf32>, vector<30x7xf32>, vector<2x7xf32> -> vector<2x7xf32>
    %c0_20 = arith.constant 0 : index
    %c0_21 = arith.constant 0 : index
    %21 = vector.load %arg9[%c0_20, %c0_21] : memref<1x7xf32, #tpu.memory_space<vmem>>, vector<1x7xf32>
    %22 = vector.broadcast %21 : vector<1x7xf32> to vector<2x7xf32>
    %23 = arith.addf %20, %22 : vector<2x7xf32>
    %c0_22 = arith.constant 0 : index
    %c0_23 = arith.constant 0 : index
    %24 = vector.load %arg10[%c0_22, %c0_23] : memref<2x7xf32, #tpu.memory_space<vmem>>, vector<2x7xf32>
    tpu.vector_store %arg10[%c0_22, %c0_23], %23 {strides = array<i32>} : memref<2x7xf32, #tpu.memory_space<vmem>>, vector<2x7xf32>,
    return
  }
  func.func @transform_0(%arg0: i32) -> (i32, i32) {
    %c0_i32 = arith.constant 0 : i32
    %c0_i32_0 = arith.constant 0 : i32
    return %arg0, %c0_i32 : i32, i32
  }
  func.func @transform_1(%arg0: i32) -> (i32, i32) {
    %c0_i32 = arith.constant 0 : i32
    %c0_i32_0 = arith.constant 0 : i32
    return %arg0, %c0_i32 : i32, i32
  }
  func.func @transform_2(%arg0: i32) -> (i32, i32) {
    %c0_i32 = arith.constant 0 : i32
    %c0_i32_0 = arith.constant 0 : i32
    %c0_i32_1 = arith.constant 0 : i32
    return %c0_i32, %c0_i32_0 : i32, i32
  }
  func.func @transform_3(%arg0: i32) -> (i32, i32) {
    %c0_i32 = arith.constant 0 : i32
    %c0_i32_0 = arith.constant 0 : i32
    %c0_i32_1 = arith.constant 0 : i32
    return %c0_i32, %c0_i32_0 : i32, i32
  }
  func.func @transform_4(%arg0: i32) -> (i32, i32) {
    %c0_i32 = arith.constant 0 : i32
    %c0_i32_0 = arith.constant 0 : i32
    %c0_i32_1 = arith.constant 0 : i32
    return %c0_i32, %c0_i32_0 : i32, i32
  }
  func.func @transform_5(%arg0: i32) -> (i32, i32) {
    %c0_i32 = arith.constant 0 : i32
    %c0_i32_0 = arith.constant 0 : i32
    %c0_i32_1 = arith.constant 0 : i32
    return %c0_i32, %c0_i32_0 : i32, i32
  }
  func.func @transform_6(%arg0: i32) -> (i32, i32) {
    %c0_i32 = arith.constant 0 : i32
    %c0_i32_0 = arith.constant 0 : i32
    %c0_i32_1 = arith.constant 0 : i32
    return %c0_i32, %c0_i32_0 : i32, i32
  }
  func.func @transform_7(%arg0: i32) -> (i32, i32) {
    %c0_i32 = arith.constant 0 : i32
    %c0_i32_0 = arith.constant 0 : i32
    %c0_i32_1 = arith.constant 0 : i32
    return %c0_i32, %c0_i32_0 : i32, i32
  }
  func.func @transform_8(%arg0: i32) -> (i32, i32) {
    %c0_i32 = arith.constant 0 : i32
    %c0_i32_0 = arith.constant 0 : i32
    %c0_i32_1 = arith.constant 0 : i32
    return %c0_i32, %c0_i32_0 : i32, i32
  }
  func.func @transform_9(%arg0: i32) -> (i32, i32) {
    %c0_i32 = arith.constant 0 : i32
    %c0_i32_0 = arith.constant 0 : i32
    return %arg0, %c0_i32 : i32, i32
  }
}

</mosaic_0001>

<bundles_post_ra>
// kernel: fwd.1
= control target key start
LH: loop header
LB: loop body
LE: loop exit
PB: predicated region body
PF: predicated region fallthrough
CT: control target
= control target key end

     0   :  { %14 = vsyncpa [#allocation3], 0  ;;  %s840_s0 = inlined_call_operand.hbm [shape: f32[2,7], index: 0, kind: input, shape index: {}]   ;;  %s841_s1 = inlined_call_operand.vmem [shape: f32[2,4], index: 1, kind: input, shape index: {}]   ;;  %s842_s2 = inlined_call_operand.vmem [shape: f32[7,20], index: 2, kind: input, shape index: {}]   ;;  %s843_s3 = inlined_call_operand.hbm [shape: f32[1,20], index: 3, kind: input, shape index: {}]   ;;  %s844_s4 = inlined_call_operand.hbm [shape: f32[20,30], index: 4, kind: input, shape index: {}]   ;;  %s845_s5 = inlined_call_operand.hbm [shape: f32[4,30], index: 5, kind: input, shape index: {}]   ;;  %s846_s6 = inlined_call_operand.hbm [shape: f32[1,30], index: 6, kind: input, shape index: {}]   ;;  %s847_s7 = inlined_call_operand.vmem [shape: f32[30,7], index: 7, kind: input, shape index: {}]   ;;  %s848_s8 = inlined_call_operand.vmem [shape: f32[1,7], index: 8, kind: input, shape index: {}]   ;;  %s849_s9 = inlined_call_operand.hbm [shape: f32[2,7], index: 9, kind: output, shape index: {}]  }
   0x1   :  { %15 = vsyncpa [#allocation6], 0 }
   0x2   :  { %16 = vsyncpa [#allocation9], 0 }
   0x3   :  { %17 = vsyncpa [#allocation4], 0  ;;  %s674_s30 = smov [#allocation5]   ;;  %s675_s11 = smov [#allocation8]  }
   0x4   :  { %s38_s10 = sshll.u32 %s674_s30, 4  ;;  %s60_s12 = sshll.u32 %s675_s11, 4  ;;  %s39_s10 = int_to_ptr.vmem [resolvable:$true] %s38_s10  ;;  %s61_s12 = int_to_ptr.vmem [resolvable:$true] %s60_s12 }
   0x5   :  { %s534_s15 = scalar_lea.hbm %s843_s3, 16 }
   0x6   :  { %p535_p0 = scmp.ne.s32.totalorder %s843_s3, %s534_s15  ;;  %p538_p1 = scmp.lt.u32.totalorder %s534_s15, %s843_s3 }
   0x8   :  { %p540_p2 = pnand %p538_p1, %p535_p0 }
   0xa   :  { %543 = shalt.err (!%p540_p2)
}
   0xb   :  { %s544_s20 = scalar_lea.vmem %s39_s10, 16  ;;  %s548_s21 = scalar_lea.vmem %s39_s10, 32 }
   0xc   :  { %p545_p3 = scmp.ne.s32.totalorder %s39_s10, %s544_s20  ;;  %p549_p4 = scmp.lt.s32.totalorder %s39_s10, %s39_s10 }
   0xd   :  { %p550_p5 = scmp.lt.s32.totalorder %s548_s21, %s544_s20 }
   0xf   :  { %p551_p6 = por %p550_p5, %p549_p4 }
  0x11   :  { %p552_p7 = pnand %p551_p6, %p545_p3 }
  0x13   :  { %555 = shalt.err (!%p552_p7)
}
  0x14   :  { %41 = dma.hbm_to_vmem [thread:$0]  %s843_s3, 16, %s39_s10, [#allocation6]  }
  0x15   :  { %s556_s26 = scalar_lea.hbm %s845_s5, 64 }
  0x16   :  { %p557_p8 = scmp.ne.s32.totalorder %s845_s5, %s556_s26  ;;  %p560_p9 = scmp.lt.u32.totalorder %s556_s26, %s845_s5 }
  0x18   :  { %p562_p10 = pnand %p560_p9, %p557_p8 }
  0x1a   :  { %565 = shalt.err (!%p562_p10)
}
  0x1b   :  { %s566_s11 = scalar_lea.vmem %s61_s12, 64  ;;  %p571_p12 = scmp.lt.s32.totalorder %s61_s12, %s61_s12 }
  0x1c   :  { %p567_p11 = scmp.ne.s32.totalorder %s61_s12, %s566_s11  ;;  %p572_p13 = scmp.lt.s32.totalorder %s566_s11, %s566_s11 }
  0x1e   :  { %p573_p0 = por %p572_p13, %p571_p12 }
  0x20   :  { %p574_p1 = pnand %p573_p0, %p567_p11 }
  0x22   :  { %577 = shalt.err (!%p574_p1)
}
  0x23   :  { %63 = dma.hbm_to_vmem [thread:$0]  %s845_s5, 64, %s61_s12, [#allocation9]  }
  0x24   :  { %s676_s13 = smov [#allocation2]   ;;  %s677_s15 = smov [#allocation7]  }
  0x25   :  { %s24_s14 = sshll.u32 %s676_s13, 4  ;;  %s47_s16 = sshll.u32 %s677_s15, 4  ;;  %s25_s14 = int_to_ptr.vmem [resolvable:$true] %s24_s14  ;;  %s760_s16 = int_to_ptr.vmem [resolvable:$true] %s47_s16 }
  0x26   :  { %s578_s19 = scalar_lea.hbm %s840_s0, 32 }
  0x27   :  { %p579_p2 = scmp.ne.s32.totalorder %s840_s0, %s578_s19  ;;  %p582_p3 = scmp.lt.u32.totalorder %s578_s19, %s840_s0 }
  0x29   :  { %p584_p4 = pnand %p582_p3, %p579_p2 }
  0x2b   :  { %587 = shalt.err (!%p584_p4)
}
  0x2c   :  { %s588_s5 = scalar_lea.vmem %s25_s14, 32  ;;  %p593_p6 = scmp.lt.s32.totalorder %s25_s14, %s25_s14 }
  0x2d   :  { %p589_p5 = scmp.ne.s32.totalorder %s25_s14, %s588_s5  ;;  %p594_p7 = scmp.lt.s32.totalorder %s588_s5, %s588_s5 }
  0x2f   :  { %p595_p8 = por %p594_p7, %p593_p6 }
  0x31   :  { %p596_p9 = pnand %p595_p8, %p589_p5 }
  0x33   :  { %599 = shalt.err (!%p596_p9)
}
  0x34   :  { %27 = dma.hbm_to_vmem [thread:$0]  %s840_s0, 32, %s25_s14, [#allocation3]  }
  0x35   :  { %s600_s27 = scalar_lea.hbm %s844_s4, 384 }
  0x36   :  { %p601_p10 = scmp.ne.s32.totalorder %s844_s4, %s600_s27  ;;  %p604_p11 = scmp.lt.u32.totalorder %s600_s27, %s844_s4 }
  0x38   :  { %p606_p12 = pnand %p604_p11, %p601_p10 }
  0x3a   :  { %609 = shalt.err (!%p606_p12)
}
  0x3b   :  { %s610_s3 = scalar_lea.vmem %s760_s16, 384  ;;  %p615_p0 = scmp.lt.s32.totalorder %s760_s16, %s760_s16 }
  0x3c   :  { %p611_p13 = scmp.ne.s32.totalorder %s760_s16, %s610_s3  ;;  %p616_p1 = scmp.lt.s32.totalorder %s610_s3, %s610_s3 }
  0x3e   :  { %p617_p2 = por %p616_p1, %p615_p0 }
  0x40   :  { %p618_p3 = pnand %p617_p2, %p611_p13 }
  0x42   :  { %621 = shalt.err (!%p618_p3)
}
  0x43   :  { %s678_s0 = smov 128   ;;  %s679_s10 = smov 8  }
  0x44   :  { %53 = dma.hbm_to_vmem [thread:$0]  %s844_s4, 384, %s760_s16, [#allocation6], %s678_s0, %s678_s0, %s679_s10  }
  0x45   :  { %s680_s15 = smov [#allocation10]   ;;  %s622_s20 = scalar_lea.hbm %s846_s6, 16 }
  0x46   :  { %s70_s17 = sshll.u32 %s680_s15, 4  ;;  %p623_p4 = scmp.ne.s32.totalorder %s846_s6, %s622_s20  ;;  %s71_s17 = int_to_ptr.vmem [resolvable:$true] %s70_s17 }
  0x47   :  { %p626_p5 = scmp.lt.u32.totalorder %s622_s20, %s846_s6 }
  0x49   :  { %p628_p6 = pnand %p626_p5, %p623_p4 }
  0x4b   :  { %631 = shalt.err (!%p628_p6)
}
  0x4c   :  { %s632_s12 = scalar_lea.vmem %s71_s17, 16  ;;  %s636_s4 = scalar_lea.vmem %s71_s17, 32 }
  0x4d   :  { %p633_p7 = scmp.ne.s32.totalorder %s71_s17, %s632_s12  ;;  %p637_p8 = scmp.lt.s32.totalorder %s71_s17, %s71_s17 }
  0x4e   :  { %p638_p9 = scmp.lt.s32.totalorder %s636_s4, %s632_s12 }
  0x50   :  { %p639_p10 = por %p638_p9, %p637_p8 }
  0x52   :  { %p640_p11 = pnand %p639_p10, %p633_p7 }
  0x54   :  { %643 = shalt.err (!%p640_p11)
}
  0x55   :  { %73 = dma.hbm_to_vmem [thread:$0]  %s846_s6, 16, %s71_s17, [#allocation9]  }
  0x56   :  { %666 = dma.done.wait [#allocation3], 32  }
  0x57   :  { %667 = vsyncadd [#allocation3], 4294967264 }
  0x58   :  { %668 = dma.done.wait [#allocation6], 400  }
  0x59   :  { %669 = vsyncadd [#allocation6], 4294966896 }
  0x5a   :  { %670 = dma.done.wait [#allocation9], 80  }
  0x5b   :  { %671 = vsyncadd [#allocation9], 4294967216  ;;  %v681_v0 = vmov 0.0   ;;  %vm682_vm0 = vmmov 0   ;;  %vm106_vm1 = vcmask 1046528   ;;  %vm102_vm2 = vcmask 56320  }
  0x5c   :  { %482 = vmatprep.subr.mxu0 %v681_v0  ;;  %484 = vmatprep.mubr.msk.f32.mxu0 %vm682_vm0, %v681_v0  ;;  %v94_v1 = vld [vmem:[%s842_s2] sm:$0x7f]  ;;  %v182_v4 = vld [vmem:[#allocation7 + $0x8] sm:$0xff]  ;;  %v683_v5 = vmov 0.0|0.0   ;;  %v185_v7 = vld [vmem:[#allocation8] sm:$0xf] }
  0x5d   :  { %487 = vmatprep.subr.mxu1 %v681_v0  ;;  %489 = vmatprep.mubr.msk.f32.mxu1 %vm682_vm0, %v681_v0  ;;  %v93_v2 = vld [vmem:[#allocation2] sm:$0x3]  ;;  %v181_v3 = vld [vmem:[#allocation7] sm:$0xff]  ;;  %vm190_vm3 = vcmask 1043456   ;;  %v183_v8 = vld [vmem:[#allocation7 + $0x10] sm:$0xf] }
  0x5e   :  { %483 = vmatpush3.msk.msra.mxu0 %vm106_vm1, %v94_v1  ;;  %v513_v6 = vpack.c.bf16 %v182_v4, %v181_v3  ;;  %488 = vmatpush3.msk.msra.mxu1 %vm190_vm3, %v185_v7  ;;  %v184_v9 = vld [vmem:[%s841_s1] sm:$0x3]  ;;  %vm186_vm4 = vcmask 31744   ;;  %v458_v10 = vld [vmem:[#allocation5] ss:$0 sm:$0xff]  ;;  %vm264_vm5 = vcmask 162816  }
  0x5f   :  { %485 = vmatmul.mubr.msk.f32.vlgmr.msra.gmra.mrb[0].mxu0 %vm102_vm2, %v93_v2  ;;  %512 = vmatprep.subr.bf16.mxu0 %v683_v5  ;;  %v350_v15 = vld [vmem:[%s847_s7] sm:$0xff]  ;;  %v351_v16 = vld [vmem:[%s847_s7 + $0x8] sm:$0xff]  ;;  %v352_v20 = vld [vmem:[%s847_s7 + $0x10] sm:$0xff]  ;;  %vm365_vm6 = vcmask 1045504   ;;  %vm684_vm7 = vmmov 1   ;;  %vm361_vm9 = vcmask 244736  }
  0x60   :  { %498 = vmatprep.mubr.msk.f32.mxu0 %vm682_vm0, %v681_v0  ;;  %514 = vmatpush3.bf16.msra.mxu0 %v513_v6  ;;  %v516_v17 = vpack.c.bf16 %v351_v16, %v350_v15  ;;  %v353_v21 = vld [vmem:[%s847_s7 + $0x18] sm:$0x3f]  ;;  %vm520_vm8 = vmpackc.low %vm365_vm6, %vm684_vm7  ;;  %v465_v24 = vld [vmem:[#allocation10] ss:$0 sm:$0xff]  ;;  %s685_s14 = smov [#allocation11]   ;;  %vm439_vm10 = vcmask 50176  }
  0x61   :  { %496 = vmatprep.subr.mxu0 %v681_v0  ;;  %490 = vmatmul.mubr.msk.f32.vlgmr.msra.gmra.mrb[0].mxu1 %vm186_vm4, %v184_v9  ;;  %v519_v22 = vpack.c.bf16 %v353_v21, %v352_v20  ;;  %v466_v29 = vld [vmem:[%s848_s8] ss:$0 sm:$0xff]  ;;  %s447_s15 = sshll.u32 %s685_s14, 4  ;;  %s448_s15 = int_to_ptr.vmem [resolvable:$true] %s447_s15 }
  0x62   :  { %515 = vmatprep.subr.bf16.mxu1 %v683_v5  ;;  %509 = vmatprep.mubr.msk.f32.mxu1 %vm682_vm0, %v681_v0  ;;  %s644_s7 = scalar_lea.vmem %s448_s15, 32  ;;  %p649_p13 = scmp.lt.s32.totalorder %s448_s15, %s448_s15 }
  0x63   :  { %517 = vmatpush3.bf16.msra.mxu1 %v516_v17  ;;  %p645_p12 = scmp.ne.s32.totalorder %s448_s15, %s644_s7  ;;  %p650_p0 = scmp.lt.s32.totalorder %s644_s7, %s644_s7 }
  0x64   :  { %497 = vmatpush3.msk.msra.mxu0 %vm190_vm3, %v183_v8  ;;  %518 = vmatprep.subr.bf16.mxu1 %v683_v5 }
  0x65   :  { %p651_p1 = por %p650_p0, %p649_p13 }
  0x67   :  { %521 = vmatpush3.bf16.msk.msra.mxu1 %vm520_vm8, %v519_v22  ;;  %p652_p2 = pnand %p651_p1, %p645_p12 }
 0x132   :  { %v176_v11 = vpop.f32.mrb[0].mxu0 }
 0x133   :  { %v177_v12 = vadd.f32 %v458_v10, %v176_v11  ;;  %v486_v13 = vpop.f32.mrb[1].mxu0 }
 0x134   :  { %v260_v18 = vpop.f32.mrb[0].mxu1 }
 0x135   :  { %v180_v14 = vmax.f32 %v177_v12, 0.0  ;;  %v491_v19 = vpop.f32.mrb[1].mxu1 }
 0x137   :  { %499 = vmatmul.mubr.msk.f32.vlgmr.msra.gmra.mrb[2].mxu0 %vm264_vm5, %v180_v14 }
 0x20a   :  { %v337_v23 = vpop.f32.mrb[2].mxu0 }
 0x20b   :  { %v338_v25 = vadd.f32 %v337_v23, %v260_v18  ;;  %v500_v26 = vpop.f32.mrb[3].mxu0 }
 0x20d   :  { %v348_v27 = vadd.f32 %v465_v24, %v338_v25 }
 0x20f   :  { %v349_v28 = vmax.f32 %v348_v27, 0.0 }
 0x211   :  { %510 = vmatmul.mubr.msk.f32.vlgmr.msra.gmra.mrb[2].mxu1 %vm361_vm9, %v349_v28 }
 0x2e4   :  { %v435_v30 = vpop.f32.mrb[2].mxu1 }
 0x2e5   :  { %v436_v31 = vadd.f32 %v466_v29, %v435_v30  ;;  %v511_v32 = vpop.f32.mrb[3].mxu1 }
 0x2e7   :  { %440 = vst.msk [vmem:[#allocation11] sm:$0x3] %vm439_vm10, %v436_v31 }
 0x2e8   :  { %655 = shalt.err (!%p652_p2)
}
 0x2e9   :  { %s656_s19 = scalar_lea.hbm %s849_s9, 32 }
 0x2ea   :  { %p657_p3 = scmp.ne.s32.totalorder %s849_s9, %s656_s19  ;;  %p660_p4 = scmp.lt.u32.totalorder %s656_s19, %s849_s9 }
 0x2ec   :  { %p662_p5 = pnand %p660_p4, %p657_p3 }
 0x2ee   :  { %665 = shalt.err (!%p662_p5)
}
 0x2ef   :  { %450 = dma.vmem_to_hbm [thread:$0]  %s448_s15, 32, %s849_s9, [#allocation4]  }
 0x2f0   :  { %672 = dma.done.wait [#allocation4], 32  }
 0x2f1   :  { %673 = vsyncadd [#allocation4], 4294967264 }
 0x2f2   :  { %454 = vsyncpa [#allocation3], 1 }
 0x2f3   :  { %455 = vsyncpa [#allocation6], 1 }
 0x2f4   :  { %456 = vsyncpa [#allocation9], 1 }
 0x2f5   :  { %457 = vsyncpa [#allocation4], 1 }

</bundles_post_ra>
